<compile_context>
chip_gen: v5e
topology: v5e:2x2
jax: 0.10.0
libtpu: 0.0.40
codegen_flags: <defaults>
</compile_context>

<pallas_src>
import jax
import jax.numpy as jnp
from jax.experimental import pallas as pl
from jax.experimental.pallas import tpu as pltpu


def _round_up(n, m):
    return ((n + m - 1) // m) * m


def _qnet_duel_kernel(x_ref, w1_ref, b1_ref, wq_ref, bq_ref, q_ref):
    """One batch tile.

    x_ref  : (bm, I)      f32   (cast to bf16 in-kernel for the MXU)
    w1_ref : (I, H_pad)   bf16
    b1_ref : (1, H_pad)   f32
    wq_ref : (H_pad, O)   bf16  (dueling algebra pre-folded)
    bq_ref : (1, O)       f32
    q_ref  : (bm, O)      f32
    """
    x = x_ref[...].astype(jnp.bfloat16)
    hidden = jnp.dot(x, w1_ref[...], preferred_element_type=jnp.float32)
    hidden = jnp.maximum(hidden + b1_ref[...], 0.0)          # (bm, H_pad), f32

    q = jnp.dot(hidden.astype(jnp.bfloat16), wq_ref[...],
                preferred_element_type=jnp.float32)
    q_ref[...] = (q + bq_ref[...]).astype(q_ref.dtype)        # (bm, O)


def prepare_params(params):
    """One-time weight prep: fold the dueling head, pad H to 128, cast to bf16.

    q[:, j] = h@W2[:, j] + b2[j] + h@w3 + b3 - (h@mean_j(W2) + mean_j(b2))
            = h@(W2[:, j] + w3 - mean_j(W2)) + (b2[j] + b3 - mean_j(b2))
    so the fold is exact; zero-padded H rows/cols contribute exactly zero
    (relu(0 + 0) = 0 and the corresponding W_q rows are zero).
    """
    w1, b1, w2, b2, w3, b3 = params
    H = w1.shape[1]

    wq = w2 + w3 - jnp.mean(w2, axis=1, keepdims=True)         # (H, O)
    bq = b2 + b3 - jnp.mean(b2, axis=-1, keepdims=True)        # (1, O)

    H_pad = _round_up(H, 128)
    if H_pad != H:
        w1 = jnp.pad(w1, ((0, 0), (0, H_pad - H)))
        b1 = jnp.pad(b1, ((0, 0), (0, H_pad - H)))
        wq = jnp.pad(wq, ((0, H_pad - H), (0, 0)))

    return (w1.astype(jnp.bfloat16),
            b1.astype(jnp.float32),
            wq.astype(jnp.bfloat16),
            bq.astype(jnp.float32))


def qnet_duel_forward(x, prepared, *, bm_max=1024):
    """Dueling-DQN head forward. x: (B, input_size) f32 -> (B, output_size) f32."""
    w1, b1, wq, bq = prepared
    B, I = x.shape
    H_pad = w1.shape[1]
    O = wq.shape[1]

    # Batch tiling: sublane-aligned tile, no wrapper-side padding of x
    # (ragged final block is masked on writeback).  Force >= 2 grid steps
    # when B allows so the "parallel" axis can shard across v7x TensorCores.
    n_steps = max(pl.cdiv(B, bm_max), 2 if B > 8 else 1)
    bm = _round_up(pl.cdiv(B, n_steps), 8)
    grid = (pl.cdiv(B, bm),)

    return pl.pallas_call(
        _qnet_duel_kernel,
        out_shape=jax.ShapeDtypeStruct((B, O), jnp.float32),
        grid_spec=pltpu.PrefetchScalarGridSpec(
            num_scalar_prefetch=0,
            grid=grid,
            in_specs=[
                pl.BlockSpec((bm, I), lambda i: (i, 0)),        # x tile (pipelined)
                pl.BlockSpec((I, H_pad), lambda i: (0, 0)),     # W1 (resident)
                pl.BlockSpec((1, H_pad), lambda i: (0, 0)),     # b1 (resident)
                pl.BlockSpec((H_pad, O), lambda i: (0, 0)),     # W_q (resident)
                pl.BlockSpec((1, O), lambda i: (0, 0)),         # b_q (resident)
            ],
            out_specs=pl.BlockSpec((bm, O), lambda i: (i, 0)),  # narrow (B, O) output
        ),
        compiler_params=pltpu.CompilerParams(
            dimension_semantics=("parallel",)),
    )(x, w1, b1, wq, bq)


def init_params(key, input_size, hidden_size, output_size, dtype=jnp.float32):
    """Deterministic init mimicking nn.Linear's U(-1/sqrt(fan_in), 1/sqrt(fan_in)).
    Weights are stored as (in_features, out_features)."""
    ks = jax.random.split(key, 6)

    def lin(kw, kb, fan_in, fan_out):
        bound = 1.0 / jnp.sqrt(jnp.asarray(fan_in, dtype))
        w = jax.random.uniform(kw, (fan_in, fan_out), dtype, -bound, bound)
        b = jax.random.uniform(kb, (1, fan_out), dtype, -bound, bound)
        return w, b

    w1, b1 = lin(ks[0], ks[1], input_size, hidden_size)
    w2, b2 = lin(ks[2], ks[3], hidden_size, output_size)
    w3, b3 = lin(ks[4], ks[5], hidden_size, 1)
    return (w1, b1, w2, b2, w3, b3)


def qnet_duel_ref_prepared(x, prepared):
    """Pure-JAX reference mirroring the kernel exactly (folded weights, bf16 MXU)."""
    w1, b1, wq, bq = prepared
    f32 = jnp.float32
    hidden = jnp.maximum(
        x.astype(jnp.bfloat16).astype(f32) @ w1.astype(f32) + b1, 0.0)
    return hidden.astype(jnp.bfloat16).astype(f32) @ wq.astype(f32) + bq


def qnet_duel_ref_f32(x, params):
    """Literal dueling formula in f32 (PyTorch semantics); loose-tolerance check."""
    w1, b1, w2, b2, w3, b3 = params
    hidden = jnp.maximum(x @ w1 + b1, 0.0)
    adv = hidden @ w2 + b2
    val = hidden @ w3 + b3
    return val + adv - jnp.mean(adv, axis=-1, keepdims=True)


if __name__ == "__main__":
    # Small shapes consistent with the module's forward: x is (batch, input_size).
    batch, input_size, hidden_size, output_size = 2, 16, 32, 4

    key = jax.random.PRNGKey(0)
    kx, kp, kx2 = jax.random.split(key, 3)
    x = jax.random.normal(kx, (batch, input_size), jnp.float32)
    params = init_params(kp, input_size, hidden_size, output_size)
    prepared = prepare_params(params)   # one-time weight prep (hoisted out of forward)

    q = jax.block_until_ready(qnet_duel_forward(x, prepared))
    assert q.shape == (batch, output_size)
    assert jnp.allclose(q, qnet_duel_ref_prepared(x, prepared), atol=1e-4, rtol=1e-4), \
        "mismatch vs bf16-mirrored reference (small B)"
    assert jnp.allclose(q, qnet_duel_ref_f32(x, params), atol=2e-2, rtol=2e-2), \
        "mismatch vs f32 PyTorch-style reference (small B)"

    # Exercise the multi-grid-step path with a non-aligned, non-dividing B.
    big_b = 600
    x_big = jax.random.normal(kx2, (big_b, input_size), jnp.float32)
    q_big = jax.block_until_ready(qnet_duel_forward(x_big, prepared))
    assert q_big.shape == (big_b, output_size)
    assert jnp.allclose(q_big, qnet_duel_ref_prepared(x_big, prepared), atol=1e-4, rtol=1e-4), \
        "mismatch vs bf16-mirrored reference (tiled B)"
    assert jnp.allclose(q_big, qnet_duel_ref_f32(x_big, params), atol=2e-2, rtol=2e-2), \
        "mismatch vs f32 PyTorch-style reference (tiled B)"

    print("KERNEL_OK")
</pallas_src>

<mosaic_0001>
module attributes {stable_mosaic.version = 11 : i64} {
  func.func @_qnet_duel_kernel(%arg0: i32, %arg1: memref<8x16xf32, #tpu.memory_space<vmem>>, %arg2: memref<16x128xbf16, #tpu.memory_space<vmem>>, %arg3: memref<1x128xf32, #tpu.memory_space<vmem>>, %arg4: memref<128x4xbf16, #tpu.memory_space<vmem>>, %arg5: memref<1x4xf32, #tpu.memory_space<vmem>>, %arg6: memref<8x4xf32, #tpu.memory_space<vmem>>) attributes {dimension_semantics = [#tpu.dimension_semantics<parallel>], iteration_bounds = array<i64: 1>, scalar_prefetch = 0 : i64, scratch_operands = 0 : i64, tpu.core_type = #tpu.core_type<tc>, window_params = [{transform_indices = @transform_0, window_bounds = array<i64: 8, 16>}, {pipeline_mode = #tpu.pipeline_mode<synchronous>, transform_indices = @transform_1, window_bounds = array<i64: 16, 128>}, {pipeline_mode = #tpu.pipeline_mode<synchronous>, transform_indices = @transform_2, window_bounds = array<i64: 1, 128>}, {pipeline_mode = #tpu.pipeline_mode<synchronous>, transform_indices = @transform_3, window_bounds = array<i64: 128, 4>}, {pipeline_mode = #tpu.pipeline_mode<synchronous>, transform_indices = @transform_4, window_bounds = array<i64: 1, 4>}, {transform_indices = @transform_5, window_bounds = array<i64: 8, 4>}]} {
    %c0 = arith.constant 0 : index
    %c0_0 = arith.constant 0 : index
    %0 = vector.load %arg1[%c0, %c0_0] : memref<8x16xf32, #tpu.memory_space<vmem>>, vector<8x16xf32>
    %1 = arith.truncf %0 : vector<8x16xf32> to vector<8x16xbf16>
    %c0_1 = arith.constant 0 : index
    %c0_2 = arith.constant 0 : index
    %2 = vector.load %arg2[%c0_1, %c0_2] : memref<16x128xbf16, #tpu.memory_space<vmem>>, vector<16x128xbf16>
    %cst = arith.constant dense<0.000000e+00> : vector<8x128xf32>
    %3 = tpu.matmul %1, %2, %cst {dimension_numbers = #tpu.dot_dimension_numbers<[1], [0], [0], [1], [0, 0, 1, 1], [], []>} : vector<8x16xbf16>, vector<16x128xbf16>, vector<8x128xf32> -> vector<8x128xf32>
    %c0_3 = arith.constant 0 : index
    %c0_4 = arith.constant 0 : index
    %4 = vector.load %arg3[%c0_3, %c0_4] : memref<1x128xf32, #tpu.memory_space<vmem>>, vector<1x128xf32>
    %5 = vector.broadcast %4 : vector<1x128xf32> to vector<8x128xf32>
    %6 = arith.addf %3, %5 : vector<8x128xf32>
    %cst_5 = arith.constant 0.000000e+00 : f32
    %7 = vector.broadcast %cst_5 : f32 to vector<8x128xf32>
    %8 = arith.maximumf %6, %7 : vector<8x128xf32>
    %9 = arith.truncf %8 : vector<8x128xf32> to vector<8x128xbf16>
    %c0_6 = arith.constant 0 : index
    %c0_7 = arith.constant 0 : index
    %10 = vector.load %arg4[%c0_6, %c0_7] : memref<128x4xbf16, #tpu.memory_space<vmem>>, vector<128x4xbf16>
    %cst_8 = arith.constant dense<0.000000e+00> : vector<8x4xf32>
    %11 = tpu.matmul %9, %10, %cst_8 {dimension_numbers = #tpu.dot_dimension_numbers<[1], [0], [0], [1], [0, 0, 1, 1], [], []>} : vector<8x128xbf16>, vector<128x4xbf16>, vector<8x4xf32> -> vector<8x4xf32>
    %c0_9 = arith.constant 0 : index
    %c0_10 = arith.constant 0 : index
    %12 = vector.load %arg5[%c0_9, %c0_10] : memref<1x4xf32, #tpu.memory_space<vmem>>, vector<1x4xf32>
    %13 = vector.broadcast %12 : vector<1x4xf32> to vector<8x4xf32>
    %14 = arith.addf %11, %13 : vector<8x4xf32>
    %c0_11 = arith.constant 0 : index
    %c0_12 = arith.constant 0 : index
    %15 = vector.load %arg6[%c0_11, %c0_12] : memref<8x4xf32, #tpu.memory_space<vmem>>, vector<8x4xf32>
    tpu.vector_store %arg6[%c0_11, %c0_12], %14 {strides = array<i32>} : memref<8x4xf32, #tpu.memory_space<vmem>>, vector<8x4xf32>,
    return
  }
  func.func @transform_0(%arg0: i32) -> (i32, i32) {
    %c0_i32 = arith.constant 0 : i32
    %c0_i32_0 = arith.constant 0 : i32
    return %arg0, %c0_i32 : i32, i32
  }
  func.func @transform_1(%arg0: i32) -> (i32, i32) {
    %c0_i32 = arith.constant 0 : i32
    %c0_i32_0 = arith.constant 0 : i32
    %c0_i32_1 = arith.constant 0 : i32
    return %c0_i32, %c0_i32_0 : i32, i32
  }
  func.func @transform_2(%arg0: i32) -> (i32, i32) {
    %c0_i32 = arith.constant 0 : i32
    %c0_i32_0 = arith.constant 0 : i32
    %c0_i32_1 = arith.constant 0 : i32
    return %c0_i32, %c0_i32_0 : i32, i32
  }
  func.func @transform_3(%arg0: i32) -> (i32, i32) {
    %c0_i32 = arith.constant 0 : i32
    %c0_i32_0 = arith.constant 0 : i32
    %c0_i32_1 = arith.constant 0 : i32
    return %c0_i32, %c0_i32_0 : i32, i32
  }
  func.func @transform_4(%arg0: i32) -> (i32, i32) {
    %c0_i32 = arith.constant 0 : i32
    %c0_i32_0 = arith.constant 0 : i32
    %c0_i32_1 = arith.constant 0 : i32
    return %c0_i32, %c0_i32_0 : i32, i32
  }
  func.func @transform_5(%arg0: i32) -> (i32, i32) {
    %c0_i32 = arith.constant 0 : i32
    %c0_i32_0 = arith.constant 0 : i32
    return %arg0, %c0_i32 : i32, i32
  }
}

</mosaic_0001>

<bundles_post_ra>
// kernel: tpu_custom_call.1
= control target key start
LH: loop header
LB: loop body
LE: loop exit
PB: predicated region body
PF: predicated region fallthrough
CT: control target
= control target key end

     0   :  { %10 = vsyncpa [#allocation3], 0  ;;  %vm36_vm0 = vcmask 130048   ;;  %vm136_vm1 = vcmask 31744   ;;  %s305_s0 = inlined_call_operand.vmem [shape: f32[2,16], index: 0, kind: input, shape index: {}]   ;;  %s306_s1 = inlined_call_operand.vmem [shape: bf16[16,128], index: 1, kind: input, shape index: {}]   ;;  %s307_s2 = inlined_call_operand.vmem [shape: f32[1,128], index: 2, kind: input, shape index: {}]   ;;  %s308_s3 = inlined_call_operand.vmem [shape: bf16[128,4], index: 3, kind: input, shape index: {}]   ;;  %s309_s4 = inlined_call_operand.vmem [shape: f32[1,4], index: 4, kind: input, shape index: {}]   ;;  %s310_s5 = inlined_call_operand.hbm [shape: f32[2,4], index: 5, kind: output, shape index: {}]  }
   0x1   :  { %v193_v0 = vld [vmem:[%s306_s1] sm:$0xff]  ;;  %v201_v3 = vld [vmem:[%s308_s3 + $0x38] sm:$0xff]  ;;  %v200_v4 = vld [vmem:[%s308_s3 + $0x30] sm:$0xff] }
   0x2   :  { %v22_v1 = vld [vmem:[%s305_s0] sm:$0xff]  ;;  %47 = vmatpush.bf16.msra.mxu0 %v193_v0  ;;  %123 = vmatpush.bf16.msra.mxu1 %v201_v3  ;;  %v199_v5 = vld [vmem:[%s308_s3 + $0x28] sm:$0xff]  ;;  %v197_v7 = vld [vmem:[%s308_s3 + $0x18] sm:$0xff] }
   0x3   :  { %v23_v2 = vpack.c.bf16 %v22_v1, %v22_v1  ;;  %v198_v6 = vld [vmem:[%s308_s3 + $0x20] sm:$0xff]  ;;  %v196_v8 = vld [vmem:[%s308_s3 + $0x10] sm:$0xff]  ;;  %v195_v9 = vld [vmem:[%s308_s3 + $0x8] sm:$0xff] }
   0x4   :  { %v194_v10 = vld [vmem:[%s308_s3] sm:$0xff] }
   0x5   :  { %160 = vmatmul.msk.bf16.vlgmr.msra.gmra.mxu0 %vm36_vm0, %v23_v2  ;;  %v205_v11 = vld [vmem:[%s307_s2] ss:$0 sm:$0xff] }
   0x6   :  { %124 = vmatpush.bf16.msra.mxu1 %v200_v4  ;;  %v206_v17 = vld [vmem:[%s309_s4] ss:$0 sm:$0xff] }
   0xa   :  { %125 = vmatpush.bf16.msra.mxu1 %v199_v5 }
   0xe   :  { %126 = vmatpush.bf16.msra.mxu1 %v198_v6 }
  0x12   :  { %127 = vmatpush.bf16.msra.mxu1 %v197_v7 }
  0x16   :  { %128 = vmatpush.bf16.msra.mxu1 %v196_v8 }
  0x1a   :  { %129 = vmatpush.bf16.msra.mxu1 %v195_v9 }
  0x1e   :  { %130 = vmatpush.bf16.msra.mxu1 %v194_v10 }
  0x82   :  { %v49_v12 = vpop.f32.mrf.mxu0 }
  0x83   :  { %v50_v13 = vadd.f32 %v205_v11, %v49_v12 }
  0x85   :  { %v53_v14 = vmax.f32 %v50_v13, 0.0 }
  0x87   :  { %v54_v15 = vpack.c.bf16 %v53_v14, %v53_v14 }
  0x89   :  { %131 = vmatmul.bf16.vlgmr.msra.gmra.mxu1 %v54_v15 }
  0x8a   :  { %v51_v16 = vpop.f32.mrf.mxu0 }
 0x106   :  { %v132_v18 = vpop.f32.mrf.mxu1 }
 0x107   :  { %v133_v19 = vadd.f32 %v206_v17, %v132_v18 }
 0x109   :  { %137 = vst.msk [vmem:[#allocation2] sm:$0xff] %vm136_vm1, %v133_v19 }
 0x10e   :  { %v134_v20 = vpop.f32.mrf.mxu1 }
 0x10f   :  { %141 = vsyncadd [#allocation3], 96  ;;  %s144_s2 = sshll.u32 %s310_s5, 4  ;;  %s233_s16 = smov [#allocation2]   ;;  %s145_s2 = int_to_ptr.hbm [resolvable:$true] %s144_s2 }
 0x110   :  { %s142_s17 = sshll.u32 %s233_s16, 4  ;;  %s234_s18 = smov 32   ;;  %s143_s17 = int_to_ptr.vmem [resolvable:$true] %s142_s17 }
 0x111   :  { %s235_s19 = smov 2  }
 0x112   :  { %150 = dma.vmem_to_hbm [thread:$0]  %s143_s17, 32, %s145_s2, [#allocation3], %s234_s18, %s234_s18, %s235_s19  }
 0x113   :  { %231 = dma.done.wait [#allocation3], 128  }
 0x114   :  { %232 = vsyncadd [#allocation3], 4294967168 }
 0x115   :  { %155 = vsyncpa [#allocation3], 1 }

</bundles_post_ra>
